<compile_context>
chip_gen: v6e
topology: v6e:2x2x1
jax: 0.10.0
libtpu: 0.0.40
codegen_flags: <defaults>
</compile_context>

<pallas_src>
import functools
import math

import numpy as np
import jax
import jax.numpy as jnp
from jax import lax
from jax.experimental import pallas as pl
from jax.experimental.pallas import tpu as pltpu


def _coeff_kernel(zk_ref, vbd_ref, out_ref, *, tn, tiles_per_core, n_rows):
    """Per-core partial coeffs: sum over rows of (zk_tile @ Vbd)^2.

    grid = (num_core_splits, tiles_per_core); axis 0 is "parallel" (megacore),
    axis 1 is the sequential N reduction. out_ref is this core's (1,1,lane_w)
    partial and stays VMEM-resident across axis 1.
    """
    c = pl.program_id(0)
    i = pl.program_id(1)

    @pl.when(i == 0)
    def _init():
        out_ref[...] = jnp.zeros_like(out_ref)

    # Mask rows past the end of zk (ragged last tile / phantom tiles that the
    # clamped index_map re-reads): zeroed rows contribute nothing.
    row_start = (c * tiles_per_core + i) * tn
    valid = n_rows - row_start
    rows = lax.broadcasted_iota(jnp.int32, (tn, 1), 0)
    zk = jnp.where(rows < valid, zk_ref[...], jnp.zeros((), zk_ref.dtype))

    # (tn, lane_w) @ (lane_w, lane_w) on the MXU, f32 accumulation.
    proj = jnp.dot(zk, vbd_ref[...], preferred_element_type=jnp.float32)
    sq = proj * proj
    out_ref[...] += jnp.sum(sq, axis=0, keepdims=True)[None]


def _choose_tn(n_rows, lane_w, in_itemsize, *, sublane,
               target_tile_bytes=4 << 20, footprint_cap_bytes=24 << 20):
    """N-tile sizing with honest VMEM accounting.

    Rows occupy ceil(lane_w/128)*128 lanes in VMEM regardless of lane_w.
    Per-row footprint: 2x double-buffered zk tile (input dtype) + masked zk
    copy (input dtype) + proj + sq (f32). Target >= ~4 MiB of zk bytes per
    tile to amortize grid-step overhead; cap the total at ~24 MiB so it stays
    inside a 32 MiB scoped limit on all of v5e / v6e / v7x.
    """
    lane_pad = -(-lane_w // 128) * 128
    in_row = lane_pad * in_itemsize
    f32_row = lane_pad * 4
    per_row = 3 * in_row + 2 * f32_row
    tn_cap = max(sublane, footprint_cap_bytes // per_row)
    tn_tgt = max(sublane, target_tile_bytes // in_row)
    tn = min(tn_cap, tn_tgt)
    tn = max(sublane, (tn // sublane) * sublane)
    if tn >= n_rows:
        return n_rows
    return tn


@functools.partial(
    jax.jit,
    static_argnames=("scale", "tn", "num_core_splits", "input_dtype"))
def eig_coeff_reg_loss(zk, abs_v, target_n, mask, *, scale, tn=None,
                       num_core_splits=2, input_dtype=None):
    """scale * sum((target_n - coeffs/sum(coeffs))^2 * mask) / D via Pallas."""
    n, d = zk.shape
    if input_dtype is None:
        input_dtype = zk.dtype
    input_dtype = jnp.dtype(input_dtype)
    zk = zk.astype(input_dtype)

    # Lane-dense fold: pack `fold` logical rows per (up to) 128-lane row.
    # Contiguous reshape -> no HBM copy; gcd keeps it exact for any N.
    fold = math.gcd(128 // d, n) if (d <= 128 and 128 % d == 0) else 1
    n_r = n // fold
    lane_w = fold * d
    zk_r = zk.reshape(n_r, lane_w)
    # Block-diagonal |V| (fold copies) so every lane group projects onto V.
    vbd = jnp.kron(jnp.eye(fold, dtype=jnp.float32),
                   abs_v.astype(jnp.float32)).astype(input_dtype)

    itemsize = input_dtype.itemsize
    sublane = max(8, 32 // itemsize)        # 8 for f32, 16 for bf16, 32 for int8
    if tn is None:
        tn = _choose_tn(n_r, lane_w, itemsize, sublane=sublane)
    tn = int(tn)

    n_tiles = int(pl.cdiv(n_r, tn))
    n_cores = max(1, int(num_core_splits))
    tiles_per_core = int(pl.cdiv(n_tiles, n_cores))
    last_blk = n_tiles - 1

    kernel = functools.partial(_coeff_kernel, tn=tn,
                               tiles_per_core=tiles_per_core, n_rows=n_r)

    partials = pl.pallas_call(
        kernel,
        out_shape=jax.ShapeDtypeStruct((n_cores, 1, lane_w), jnp.float32),
        grid_spec=pltpu.PrefetchScalarGridSpec(
            num_scalar_prefetch=0,
            grid=(n_cores, tiles_per_core),
            in_specs=[
                # zk tile; clamp phantom block indices in-bounds (contribution
                # is zeroed by the in-kernel row mask).
                pl.BlockSpec(
                    (tn, lane_w),
                    lambda c, i: (jnp.minimum(c * tiles_per_core + i, last_blk), 0)),
                # block-diagonal |V| stays resident.
                pl.BlockSpec((lane_w, lane_w), lambda c, i: (0, 0)),
            ],
            out_specs=pl.BlockSpec((1, 1, lane_w), lambda c, i: (c, 0, 0)),
        ),
        compiler_params=pltpu.CompilerParams(
            dimension_semantics=("parallel", "arbitrary"),
            vmem_limit_bytes=32 * 1024 * 1024),
    )(zk_r, vbd)

    # O(D) epilogue in plain JAX (outside the streaming kernel): fold the lane
    # groups, normalize, mask, scale. The original mean's 1/N cancels under
    # the sum normalization.
    coeffs = jnp.sum(partials, axis=(0, 1)).reshape(fold, d).sum(axis=0)   # (D,)
    coeffs_n = coeffs / jnp.sum(coeffs)
    err = jnp.where(mask != 0, target_n.astype(jnp.float32) - coeffs_n, 0.0)
    return jnp.sum(err * err) * (float(scale) / float(d))


def precompute_spectrum(dynamics, *, power=-2.0, fs_zero_tol=0.0):
    """Host-side eigendecomposition + target construction (uploaded once)."""
    # TODO(synk): torch.linalg.eig (general non-symmetric eigendecomposition)
    # has no Pallas/TPU equivalent; it is evaluated host-side with numpy.
    w, v = np.linalg.eig(np.asarray(dynamics, dtype=np.float64))
    eig_fs = np.abs(np.log(w.astype(np.complex128)).imag / np.pi)   # (D,)
    abs_v = np.abs(v)                                               # (D, D)
    target = (1.0 + eig_fs) ** power
    target_n = target / target.sum()
    # torch semantics use exact `eig_fs == 0`; fs_zero_tol > 0 guards against a
    # noisy host eigensolver.
    nz = (eig_fs > fs_zero_tol) if fs_zero_tol > 0.0 else (eig_fs != 0.0)
    consts = (jnp.asarray(abs_v, jnp.float32),
              jnp.asarray(target_n, jnp.float32),
              jnp.asarray(nz.astype(np.float32)))
    return consts, eig_fs.astype(np.float32), abs_v.astype(np.float32)


def eig_coeff_reg_forward(dynamics, zk, *, scale=0.5, power=-2.0, tn=None,
                          num_core_splits=2, input_dtype=None):
    """One-shot convenience wrapper mirroring EigCoeffReg.forward."""
    (abs_v, target_n, mask), eig_fs, abs_v_np = precompute_spectrum(
        dynamics, power=power)
    loss = eig_coeff_reg_loss(jnp.asarray(zk), abs_v, target_n, mask,
                              scale=float(scale), tn=tn,
                              num_core_splits=num_core_splits,
                              input_dtype=input_dtype)
    return loss, eig_fs, abs_v_np


def _reference(zk, abs_v, eig_fs, scale, power):
    proj = zk @ abs_v
    coeffs = (proj ** 2).sum(axis=0)            # 1/N cancels under normalization
    target = (1.0 + eig_fs) ** power
    coeffs_n = coeffs / coeffs.sum()
    target_n = target / target.sum()
    err = np.where(eig_fs == 0.0, 0.0, target_n - coeffs_n)
    return float((err ** 2).sum() / err.shape[0] * scale)


if __name__ == "__main__":
    D = 32    # latent (Koopman) dimension -> linear_dynamics.weight is (D, D)
    N = 64    # number of latent samples zk
    scale = 0.5
    power = -2.0

    key = jax.random.PRNGKey(0)
    k1, k2, k3 = jax.random.split(key, 3)
    dynamics = (0.1 * jax.random.normal(k1, (D, D), dtype=jnp.float32)
                + 0.9 * jnp.eye(D, dtype=jnp.float32))
    zk = jax.random.normal(k2, (N, D), dtype=jnp.float32)

    (abs_v_dev, target_n_dev, mask_dev), eig_fs, abs_v_np = precompute_spectrum(
        dynamics, power=power)

    # 1) f32 path, auto tile size (lane-dense fold=4 -> 16 packed rows).
    loss_f32 = eig_coeff_reg_loss(zk, abs_v_dev, target_n_dev, mask_dev,
                                  scale=scale)
    loss_f32 = jax.block_until_ready(loss_f32)
    ref_f32 = _reference(np.asarray(zk, np.float64),
                         abs_v_np.astype(np.float64),
                         eig_fs.astype(np.float64), scale, power)
    assert np.allclose(float(loss_f32), ref_f32, rtol=1e-4, atol=1e-8), \
        (float(loss_f32), ref_f32)

    # 2) bf16-input path (bf16 MXU inputs, f32 accumulation/epilogue),
    #    multi-tile over both grid "cores"; reference built from bf16-rounded
    #    inputs to isolate kernel correctness.
    loss_bf16 = eig_coeff_reg_loss(zk, abs_v_dev, target_n_dev, mask_dev,
                                   scale=scale, tn=16,
                                   input_dtype=jnp.bfloat16)
    loss_bf16 = jax.block_until_ready(loss_bf16)
    zk_r = np.asarray(zk.astype(jnp.bfloat16).astype(jnp.float32), np.float64)
    v_r = np.asarray(abs_v_dev.astype(jnp.bfloat16).astype(jnp.float32),
                     np.float64)
    ref_bf16 = _reference(zk_r, v_r, eig_fs.astype(np.float64), scale, power)
    assert np.allclose(float(loss_bf16), ref_bf16, rtol=2e-3, atol=1e-7), \
        (float(loss_bf16), ref_bf16)

    # 3) ragged + phantom tile path: N=88 -> 22 packed rows, tn=8 gives a
    #    ragged last tile and a clamped phantom tile on the second core split.
    zk88 = jax.random.normal(k3, (88, D), dtype=jnp.float32)
    loss_rag = eig_coeff_reg_loss(zk88, abs_v_dev, target_n_dev, mask_dev,
                                  scale=scale, tn=8)
    loss_rag = jax.block_until_ready(loss_rag)
    ref_rag = _reference(np.asarray(zk88, np.float64),
                         abs_v_np.astype(np.float64),
                         eig_fs.astype(np.float64), scale, power)
    assert np.allclose(float(loss_rag), ref_rag, rtol=1e-4, atol=1e-8), \
        (float(loss_rag), ref_rag)

    print("KERNEL_OK")
</pallas_src>

<mosaic_0001>
module attributes {stable_mosaic.version = 11 : i64} {
  func.func @_coeff_kernel(%arg0: i32, %arg1: i32, %arg2: memref<16x128xf32, #tpu.memory_space<vmem>>, %arg3: memref<128x128xf32, #tpu.memory_space<vmem>>, %arg4: memref<1x1x128xf32, #tpu.memory_space<vmem>>) attributes {dimension_semantics = [#tpu.dimension_semantics<parallel>, #tpu.dimension_semantics<arbitrary>], iteration_bounds = array<i64: 2, 1>, scalar_prefetch = 0 : i64, scratch_operands = 0 : i64, tpu.core_type = #tpu.core_type<tc>, window_params = [{transform_indices = @transform_0, window_bounds = array<i64: 16, 128>}, {pipeline_mode = #tpu.pipeline_mode<synchronous>, transform_indices = @transform_1, window_bounds = array<i64: 128, 128>}, {transform_indices = @transform_2, window_bounds = array<i64: 1, 1, 128>}]} {
    %c0_i32 = arith.constant 0 : i32
    %0 = arith.cmpi eq, %arg1, %c0_i32 : i32
    %1 = arith.extui %0 : i1 to i32
    %c0_i32_0 = arith.constant 0 : i32
    %2 = arith.cmpi ne, %1, %c0_i32_0 : i32
    scf.if %2 {
      %cst_13 = arith.constant 0.000000e+00 : f32
      %24 = vector.broadcast %cst_13 : f32 to vector<1x1x128xf32>
      %c0_14 = arith.constant 0 : index
      %c0_15 = arith.constant 0 : index
      %c0_16 = arith.constant 0 : index
      %25 = vector.load %arg4[%c0_14, %c0_15, %c0_16] : memref<1x1x128xf32, #tpu.memory_space<vmem>>, vector<1x1x128xf32>
      tpu.vector_store %arg4[%c0_14, %c0_15, %c0_16], %24 {strides = array<i32>} : memref<1x1x128xf32, #tpu.memory_space<vmem>>, vector<1x1x128xf32>,
    } else {
    }
    %c1_i32 = arith.constant 1 : i32
    %3 = arith.muli %arg0, %c1_i32 : i32
    %4 = arith.addi %3, %arg1 : i32
    %c16_i32 = arith.constant 16 : i32
    %5 = arith.muli %4, %c16_i32 : i32
    %c16_i32_1 = arith.constant 16 : i32
    %6 = arith.subi %c16_i32_1, %5 : i32
    %7 = tpu.iota {dimensions = array<i32: 0>} : vector<16x1xi32>
    %8 = vector.broadcast %6 : i32 to vector<16x1xi32>
    %9 = arith.cmpi slt, %7, %8 : vector<16x1xi32>
    %c0 = arith.constant 0 : index
    %c0_2 = arith.constant 0 : index
    %10 = vector.load %arg2[%c0, %c0_2] : memref<16x128xf32, #tpu.memory_space<vmem>>, vector<16x128xf32>
    %cst = arith.constant 0.000000e+00 : f32
    %11 = vector.shape_cast %9 : vector<16x1xi1> to vector<16x1xi1>
    %12 = vector.broadcast %11 : vector<16x1xi1> to vector<16x128xi1>
    %13 = vector.broadcast %cst : f32 to vector<16x128xf32>
    %14 = arith.select %12, %10, %13 : vector<16x128xi1>, vector<16x128xf32>
    %c0_3 = arith.constant 0 : index
    %c0_4 = arith.constant 0 : index
    %15 = vector.load %arg3[%c0_3, %c0_4] : memref<128x128xf32, #tpu.memory_space<vmem>>, vector<128x128xf32>
    %cst_5 = arith.constant dense<0.000000e+00> : vector<16x128xf32>
    %16 = tpu.matmul %14, %15, %cst_5 {dimension_numbers = #tpu.dot_dimension_numbers<[1], [0], [0], [1], [0, 0, 1, 1], [], []>} : vector<16x128xf32>, vector<128x128xf32>, vector<16x128xf32> -> vector<16x128xf32>
    %17 = arith.mulf %16, %16 : vector<16x128xf32>
    %c0_6 = arith.constant 0 : index
    %c0_7 = arith.constant 0 : index
    %c0_8 = arith.constant 0 : index
    %18 = vector.load %arg4[%c0_6, %c0_7, %c0_8] : memref<1x1x128xf32, #tpu.memory_space<vmem>>, vector<1x1x128xf32>
    %cst_9 = arith.constant dense<0.000000e+00> : vector<128xf32>
    %19 = vector.multi_reduction <add>, %17, %cst_9 [0] : vector<16x128xf32> to vector<128xf32>
    %20 = vector.shape_cast %19 : vector<128xf32> to vector<1x128xf32>
    %21 = vector.shape_cast %20 : vector<1x128xf32> to vector<1x1x128xf32>
    %22 = arith.addf %18, %21 : vector<1x1x128xf32>
    %c0_10 = arith.constant 0 : index
    %c0_11 = arith.constant 0 : index
    %c0_12 = arith.constant 0 : index
    %23 = vector.load %arg4[%c0_10, %c0_11, %c0_12] : memref<1x1x128xf32, #tpu.memory_space<vmem>>, vector<1x1x128xf32>
    tpu.vector_store %arg4[%c0_10, %c0_11, %c0_12], %22 {strides = array<i32>} : memref<1x1x128xf32, #tpu.memory_space<vmem>>, vector<1x1x128xf32>,
    return
  }
  func.func @transform_0(%arg0: i32, %arg1: i32) -> (i32, i32) {
    %c1_i32 = arith.constant 1 : i32
    %0 = arith.muli %arg0, %c1_i32 : i32
    %1 = arith.addi %0, %arg1 : i32
    %c0_i32 = arith.constant 0 : i32
    %2 = arith.minsi %1, %c0_i32 : i32
    %c0_i32_0 = arith.constant 0 : i32
    %c0_i32_1 = arith.constant 0 : i32
    return %2, %c0_i32_0 : i32, i32
  }
  func.func @transform_1(%arg0: i32, %arg1: i32) -> (i32, i32) {
    %c0_i32 = arith.constant 0 : i32
    %c0_i32_0 = arith.constant 0 : i32
    %c0_i32_1 = arith.constant 0 : i32
    return %c0_i32, %c0_i32_0 : i32, i32
  }
  func.func @transform_2(%arg0: i32, %arg1: i32) -> (i32, i32, i32) {
    %c0_i32 = arith.constant 0 : i32
    %c0_i32_0 = arith.constant 0 : i32
    %c0_i32_1 = arith.constant 0 : i32
    return %arg0, %c0_i32, %c0_i32_0 : i32, i32, i32
  }
}

</mosaic_0001>

<bundles_post_ra>
// kernel: eig_coeff_reg_loss.1
= control target key start
LH: loop header
LB: loop body
LE: loop exit
PB: predicated region body
PF: predicated region fallthrough
CT: control target
= control target key end

     0   :  { %s485_s9 = smov 0   ;;  %s487_s10 = smov 0   ;;  %s580_s0 = inlined_call_operand.vmem [shape: f32[16,128], index: 0, kind: input, shape index: {}]   ;;  %s581_s1 = inlined_call_operand.vmem [shape: f32[128,128], index: 1, kind: input, shape index: {}]   ;;  %s582_s2 = inlined_call_operand.vmem [shape: f32[2,1,128], index: 2, kind: output, shape index: {}]  }
   0x1   :  { %s489_s11 = smov 0  }
   0x2 LB: > { %s24_s12 = sadd.s32 1, %s463_s10  ;;  %p359_p0 = scmp.ge.s32.totalorder %s467_s11, 1  ;;  %s467_s11 = sphi %s489_s11, %s12_s11   ;;  %s463_s10 = sphi %s487_s10, %s584_s10   ;;  %s459_s9 = sphi %s485_s9, %s583_s9  }
   0x3   : > { %p26_p1 = scmp.ge.s32.totalorder %s24_s12, 2  ;;  %p137_p2 = scmp.lt.s32.totalorder %s467_s11, 3 }
   0x5   : > { %s586_s12 = smov (%p26_p1, %s24_s12), 0  ;;  %p138_p3 = pnand %p359_p0, %p137_p2 }
   0x6   : > { %p161_p4 = scmp.lt.s32.totalorder (!%p138_p3), %s459_s9, 0  ;;  %s362_s17 = sshll.u32 (!%p138_p3), %s459_s9, 4 }
   0x7   : > { %141 = sbr.rel (%p138_p3) target bundleno = 259 (0x103), region = 28  ;;  %s517_s21 = ssub.s32 (!%p138_p3), 16, %s362_s17 }
   0x8   : > { %p172_p6 = scmp.lt.s32.totalorder (!%p138_p3), %s459_s9, 1 }
   0xc   : > { %v212_v0 = vld [vmem:[%s581_s1 + $0x78] sm:$0xff]  ;;  %v211_v1 = vld [vmem:[%s581_s1 + $0x70] sm:$0xff]  ;;  %v183_v2 = vlaneseq  ;;  %v210_v3 = vld [vmem:[%s581_s1 + $0x68] sm:$0xff]  ;;  %s162_s20 = scalar_select %p161_p4, %s459_s9, 0  ;;  %v186_v7 = vstv %s517_s21  ;;  %v469_v22 = vmov 0.0  }
   0xd   : > { %385 = vmatprep.subr.mxu0 %v212_v0  ;;  %v209_v4 = vld [vmem:[%s581_s1 + $0x60] sm:$0xff]  ;;  %v208_v6 = vld [vmem:[%s581_s1 + $0x58] sm:$0xff]  ;;  %v207_v8 = vld [vmem:[%s581_s1 + $0x50] sm:$0xff]  ;;  %s590_s9 = smov (!%p172_p6, %s459_s9), 1 }
   0xe   : > { %386 = vmatpush3.msra.mxu0 %v212_v0  ;;  %s360_s24 = sshll.u32 %s162_s20, 1  ;;  %v184_v5 = vshrl.u32 %v183_v2, 7  ;;  %v206_v9 = vld [vmem:[%s581_s1 + $0x48] sm:$0xff]  ;;  %v205_v11 = vld [vmem:[%s581_s1 + $0x40] sm:$0xff]  ;;  %v204_v12 = vld [vmem:[%s581_s1 + $0x38] sm:$0xff]  ;;  %s174_s3 = scalar_lea.vmem %s582_s2, %s590_s9 }
   0xf   : > { %387 = vmatprep.subr.mxu0 %v211_v1  ;;  %p164_p5 = scmp.lt.s32.totalorder %s360_s24, 1  ;;  %v203_v13 = vld [vmem:[%s581_s1 + $0x30] sm:$0xff]  ;;  %v202_v14 = vld [vmem:[%s581_s1 + $0x28] sm:$0xff]  ;;  %v201_v15 = vld [vmem:[%s581_s1 + $0x20] sm:$0xff]  ;;  %179 = vst [vmem:[%s174_s3] sm:$0x1] %v469_v22 }
  0x10   : > { %388 = vmatpush3.msra.mxu0 %v211_v1  ;;  %vm187_vm0 = vcmp.lt.s32.totalorder %v184_v5, %v186_v7  ;;  %v200_v16 = vld [vmem:[%s581_s1 + $0x18] sm:$0xff]  ;;  %v199_v17 = vld [vmem:[%s581_s1 + $0x10] sm:$0xff]  ;;  %v198_v18 = vld [vmem:[%s581_s1 + $0x8] sm:$0xff]  ;;  %v185_v19 = vadd.s32 8, %v184_v5 }
  0x11   : > { %389 = vmatprep.subr.mxu0 %v210_v3  ;;  %s588_s24 = smov (!%p164_p5, %s360_s24), 1  ;;  %v197_v20 = vld [vmem:[%s581_s1] sm:$0xff] }
  0x12   : > { %390 = vmatpush3.msra.mxu0 %v210_v3  ;;  %s361_s29 = sshll.u32 %s588_s24, 3  ;;  %vm188_vm1 = vcmp.lt.s32.totalorder %v185_v19, %v186_v7 }
  0x13   : > { %391 = vmatprep.subr.mxu0 %v209_v4  ;;  %s535_s6 = scalar_lea.vmem %s580_s0, %s361_s29 }
  0x14   : > { %392 = vmatpush3.msra.mxu0 %v209_v4  ;;  %v189_v10 = vld [vmem:[%s535_s6] sm:$0xff]  ;;  %v190_v21 = vld [vmem:[%s535_s6 + $0x8] sm:$0xff] }
  0x15   : > { %393 = vmatprep.subr.mxu0 %v208_v6  ;;  %417 = vmatprep.mubr.msk.f32.mxu0 %vm187_vm0, %v189_v10 }
  0x16   : > { %394 = vmatpush3.msra.mxu0 %v208_v6  ;;  %v290_v33 = vld [vmem:[%s174_s3] sm:$0x1] }
  0x17   : > { %395 = vmatprep.subr.mxu0 %v207_v8 }
  0x18   : > { %396 = vmatpush3.msra.mxu0 %v207_v8 }
  0x19   : > { %397 = vmatprep.subr.mxu0 %v206_v9 }
  0x1a   : > { %398 = vmatpush3.msra.mxu0 %v206_v9 }
  0x1b   : > { %399 = vmatprep.subr.mxu0 %v205_v11 }
  0x1c   : > { %400 = vmatpush3.msra.mxu0 %v205_v11 }
  0x1d   : > { %401 = vmatprep.subr.mxu0 %v204_v12 }
  0x1e   : > { %402 = vmatpush3.msra.mxu0 %v204_v12 }
  0x1f   : > { %403 = vmatprep.subr.mxu0 %v203_v13 }
  0x20   : > { %404 = vmatpush3.msra.mxu0 %v203_v13 }
  0x21   : > { %405 = vmatprep.subr.mxu0 %v202_v14 }
  0x22   : > { %406 = vmatpush3.msra.mxu0 %v202_v14 }
  0x23   : > { %407 = vmatprep.subr.mxu0 %v201_v15 }
  0x24   : > { %408 = vmatpush3.msra.mxu0 %v201_v15 }
  0x25   : > { %409 = vmatprep.subr.mxu0 %v200_v16 }
  0x26   : > { %410 = vmatpush3.msra.mxu0 %v200_v16 }
  0x27   : > { %411 = vmatprep.subr.mxu0 %v199_v17 }
  0x28   : > { %412 = vmatpush3.msra.mxu0 %v199_v17 }
  0x29   : > { %413 = vmatprep.subr.mxu0 %v198_v18 }
  0x2a   : > { %414 = vmatpush3.msra.mxu0 %v198_v18 }
  0x2b   : > { %415 = vmatprep.subr.mxu0 %v197_v20 }
  0x2c   : > { %416 = vmatpush3.msra.mxu0 %v197_v20 }
  0x2d   : > { %418 = vmatmul.mubr.msk.f32.vlgmr.msra.gmra.mxu0 %vm188_vm1, %v190_v21 }
  0xed   : > { %v419_v23 = vpop.f32.mrf.mxu0 }
  0xee   : > { %v289_v25 = vmul.f32 %v419_v23, %v419_v23 }
  0xef   : > { %v279_v24 = vpop.f32.mrf.mxu0 }
  0xf0   : > { %v288_v26 = vmul.f32 %v279_v24, %v279_v24 }
  0xf2   : > { %v291_v27 = vadd.f32 %v289_v25, %v288_v26 }
  0xf4   : > { %v292_v28 = vrot.slane %v291_v27, 4 }
  0xf6   : > { %v293_v29 = vadd.f32 %v292_v28, %v291_v27 }
  0xf8   : > { %v294_v30 = vrot.slane %v293_v29, 2 }
  0xfa   : > { %v295_v31 = vadd.f32 %v294_v30, %v293_v29 }
  0xfc   : > { %v296_v32 = vrot.slane %v295_v31, 1 }
  0xfe   : > { %v297_v34 = vadd.f32 %v296_v32, %v295_v31 }
 0x100   : > { %v298_v35 = vadd.f32 %v297_v34, %v290_v33 }
 0x102   : > { %299 = vst [vmem:[%s174_s3] sm:$0x1] %v298_v35 }
 0x103 PF: > { %s12_s11 = sadd.s32 1, %s467_s11   ;;  %s583_s9 = smov %s463_s10 }
 0x104   : > { %p9_p7 = scmp.ge.s32.totalorder %s12_s11, 4   ;;  %s584_s10 = smov %s586_s12 }
 0x106   :  { %11 = sbr.rel (!%p9_p7) target bundleno = 2 (0x2), region = 62 }

</bundles_post_ra>
